<compile_context>
chip_gen: v7x
topology: tpu7x:2x2x1
jax: 0.10.0
libtpu: 0.0.40
codegen_flags: <defaults>
</compile_context>

<pallas_src>
import functools

import jax
import jax.numpy as jnp
from jax import lax
from jax.experimental import pallas as pl
from jax.experimental.pallas import tpu as pltpu

_MIB = 1024 * 1024
_ACC_W = 256          # accumulator lane width (2 vregs)
_MAX_GROUPS = 16      # max unrolled 256-lane groups per feature tile
_TARGET_BLOCK_BYTES = 2 * _MIB


def _pick_batch_tile(B: int) -> int:
    """Batch tile: multiple of 8 dividing B (>=2 tiles when possible, for
    megacore), otherwise the full (untiled) batch dim."""
    if B % 8 != 0:
        return B
    tb = B
    upper = max(8, min(B // 2, 256))
    upper -= upper % 8
    for cand in range(upper, 7, -8):
        if B % cand == 0:
            tb = cand
            break
    return tb


def _pick_feature_tile(N: int, tb: int, itemsize: int) -> int:
    """Feature tile: byte-targeted, multiple of _ACC_W, bounded unroll."""
    n_ceil = pl.cdiv(N, _ACC_W) * _ACC_W
    tn = (_TARGET_BLOCK_BYTES // max(1, tb * itemsize)) // _ACC_W * _ACC_W
    return max(_ACC_W, min(tn, _MAX_GROUPS * _ACC_W, n_ceil))


def _pearson_kernel(p_ref, l_ref, out_ref, sx, sy, sxy, sx2, sy2,
                    *, n_orig: int, tn: int, tb: int, need_mask: bool):
    k = pl.program_id(1)

    @pl.when(k == 0)
    def _init():
        sx[...] = jnp.zeros_like(sx)
        sy[...] = jnp.zeros_like(sy)
        sxy[...] = jnp.zeros_like(sxy)
        sx2[...] = jnp.zeros_like(sx2)
        sy2[...] = jnp.zeros_like(sy2)

    # Per-tile partial sums held in vregs; flushed to VMEM once per tile so
    # the vector-store slot never binds.
    zeros = jnp.zeros((tb, _ACC_W), jnp.float32)
    px, py, pxy, px2, py2 = zeros, zeros, zeros, zeros, zeros
    if need_mask:
        lane = lax.broadcasted_iota(jnp.int32, (tb, _ACC_W), 1)
        tile_base = k * tn

    for g in range(tn // _ACC_W):
        g0 = g * _ACC_W
        xs = p_ref[:, g0:g0 + _ACC_W].astype(jnp.float32)
        ys = l_ref[:, g0:g0 + _ACC_W].astype(jnp.float32)
        if need_mask:
            # Zero lanes past the true feature count (remainder blocks are
            # DMA-clamped by Pallas; out-of-range lanes hold garbage).
            valid = (tile_base + g0 + lane) < n_orig
            xs = jnp.where(valid, xs, 0.0)
            ys = jnp.where(valid, ys, 0.0)
        px = px + xs
        py = py + ys
        pxy = pxy + xs * ys
        px2 = px2 + xs * xs
        py2 = py2 + ys * ys

    sx[...] += px
    sy[...] += py
    sxy[...] += pxy
    sx2[...] += px2
    sy2[...] += py2

    @pl.when(k == pl.num_programs(1) - 1)
    def _finalize():
        n = jnp.float32(n_orig)
        sum_x = jnp.sum(sx[...], axis=1, keepdims=True)    # [tb, 1]
        sum_y = jnp.sum(sy[...], axis=1, keepdims=True)
        sum_xy = jnp.sum(sxy[...], axis=1, keepdims=True)
        sum_x2 = jnp.sum(sx2[...], axis=1, keepdims=True)
        sum_y2 = jnp.sum(sy2[...], axis=1, keepdims=True)

        num = n * sum_xy - sum_x * sum_y
        var = (n * sum_x2 - sum_x * sum_x) * (n * sum_y2 - sum_y * sum_y)
        # rsqrt uses the EUP slot (effectively free); zero variance -> NaN,
        # matching the PyTorch reference.
        out_ref[...] = (num * lax.rsqrt(var)).astype(out_ref.dtype)


def pearson_loss(preds: jax.Array, labels: jax.Array, *,
                 block_n: int | None = None) -> jax.Array:
    """Pallas implementation of the Pearson module's forward pass."""
    assert preds.shape == labels.shape and preds.ndim == 2
    B, N = preds.shape
    itemsize = jnp.dtype(preds.dtype).itemsize

    tb = _pick_batch_tile(B)
    if block_n is None:
        tn = _pick_feature_tile(N, tb, itemsize)
    else:
        tn = max(_ACC_W, (int(block_n) // _ACC_W) * _ACC_W)
        tn = min(tn, pl.cdiv(N, _ACC_W) * _ACC_W)

    num_b = B // tb
    num_k = pl.cdiv(N, tn)
    need_mask = (N % tn) != 0

    # Generation-aware VMEM budget (v7x has only 64 MiB physical per core).
    footprint = (4 * tb * tn * itemsize        # 2 inputs x 2 pipeline buffers
                 + 5 * tb * _ACC_W * 4         # accumulator scratch
                 + 4 * tb * 4)                 # output block (double-buffered)
    try:
        cap = int(pltpu.get_tpu_info().vmem_capacity_bytes)
    except Exception:  # pragma: no cover - conservative fallback
        cap = 64 * _MIB
    vmem_limit = max(footprint + 8 * _MIB, 32 * _MIB)
    vmem_limit = int(min(vmem_limit, max(cap - 16 * _MIB, footprint + 4 * _MIB)))

    kernel = functools.partial(
        _pearson_kernel, n_orig=N, tn=tn, tb=tb, need_mask=need_mask)

    per_row = pl.pallas_call(
        kernel,
        grid=(num_b, num_k),
        out_shape=jax.ShapeDtypeStruct((B, 1), jnp.float32),
        in_specs=[
            pl.BlockSpec((tb, tn), lambda b, k: (b, k)),
            pl.BlockSpec((tb, tn), lambda b, k: (b, k)),
        ],
        out_specs=pl.BlockSpec((tb, 1), lambda b, k: (b, 0)),
        scratch_shapes=[pltpu.VMEM((tb, _ACC_W), jnp.float32) for _ in range(5)],
        compiler_params=pltpu.CompilerParams(
            # batch axis is independent (megacore-shardable on v7x);
            # feature axis is the reduction (accumulators persist across it).
            dimension_semantics=("parallel", "arbitrary"),
            vmem_limit_bytes=vmem_limit,
        ),
    )(preds, labels)

    # mean over the batch of per-row Pearson correlations (== sum/B).
    return jnp.mean(per_row)


def _pearson_ref(preds, labels):
    # pure-JAX reference matching the PyTorch loop semantics
    n = jnp.float32(preds.shape[1])
    sx = jnp.sum(preds, axis=1)
    sy = jnp.sum(labels, axis=1)
    sxy = jnp.sum(preds * labels, axis=1)
    sx2 = jnp.sum(preds * preds, axis=1)
    sy2 = jnp.sum(labels * labels, axis=1)
    p = (n * sxy - sx * sy) / jnp.sqrt((n * sx2 - sx**2) * (n * sy2 - sy**2))
    return jnp.mean(p)


if __name__ == "__main__":
    key = jax.random.PRNGKey(0)
    k1, k2, k3, k4 = jax.random.split(key, 4)

    # Case 1: small batch (untiled B), ragged N handled by in-kernel masking.
    B1, N1 = 4, 300
    p1 = jax.random.normal(k1, (B1, N1), dtype=jnp.float32)
    l1 = jax.random.normal(k2, (B1, N1), dtype=jnp.float32)
    loss1 = pearson_loss(p1, l1)
    jax.block_until_ready(loss1)
    ref1 = _pearson_ref(p1, l1)
    assert jnp.allclose(loss1, ref1, atol=1e-5, rtol=1e-4), (loss1, ref1)

    # Case 2: tiled batch (parallel axis), multi-step reduction axis with a
    # ragged final feature tile, correlated data.
    B2, N2 = 32, 1000
    p2 = jax.random.normal(k3, (B2, N2), dtype=jnp.float32)
    l2 = 0.25 * p2 + jax.random.normal(k4, (B2, N2), dtype=jnp.float32)
    loss2 = pearson_loss(p2, l2, block_n=256)
    jax.block_until_ready(loss2)
    ref2 = _pearson_ref(p2, l2)
    assert jnp.allclose(loss2, ref2, atol=1e-5, rtol=1e-4), (loss2, ref2)

    print("KERNEL_OK")
</pallas_src>

<mosaic_0001>
module attributes {stable_mosaic.version = 11 : i64} {
  func.func @_pearson_kernel(%arg0: i32, %arg1: i32, %arg2: memref<4x512xf32, #tpu.memory_space<vmem>>, %arg3: memref<4x512xf32, #tpu.memory_space<vmem>>, %arg4: memref<4x1xf32, #tpu.memory_space<vmem>>, %arg5: memref<4x256xf32, #tpu.memory_space<vmem>>, %arg6: memref<4x256xf32, #tpu.memory_space<vmem>>, %arg7: memref<4x256xf32, #tpu.memory_space<vmem>>, %arg8: memref<4x256xf32, #tpu.memory_space<vmem>>, %arg9: memref<4x256xf32, #tpu.memory_space<vmem>>) attributes {dimension_semantics = [#tpu.dimension_semantics<parallel>, #tpu.dimension_semantics<arbitrary>], iteration_bounds = array<i64: 1, 1>, scalar_prefetch = 0 : i64, scratch_operands = 5 : i64, tpu.core_type = #tpu.core_type<tc>, window_params = [{transform_indices = @transform_0, window_bounds = array<i64: 4, 512>}, {transform_indices = @transform_1, window_bounds = array<i64: 4, 512>}, {transform_indices = @transform_2, window_bounds = array<i64: 4, 1>}]} {
    %c0_i32 = arith.constant 0 : i32
    %0 = arith.cmpi eq, %arg1, %c0_i32 : i32
    %1 = arith.extui %0 : i1 to i32
    %c0_i32_0 = arith.constant 0 : i32
    %2 = arith.cmpi ne, %1, %c0_i32_0 : i32
    scf.if %2 {
      %cst_35 = arith.constant 0.000000e+00 : f32
      %62 = vector.broadcast %cst_35 : f32 to vector<4x256xf32>
      %c0_36 = arith.constant 0 : index
      %c0_37 = arith.constant 0 : index
      %63 = vector.load %arg5[%c0_36, %c0_37] : memref<4x256xf32, #tpu.memory_space<vmem>>, vector<4x256xf32>
      tpu.vector_store %arg5[%c0_36, %c0_37], %62 {strides = array<i32>} : memref<4x256xf32, #tpu.memory_space<vmem>>, vector<4x256xf32>,
      %cst_38 = arith.constant 0.000000e+00 : f32
      %64 = vector.broadcast %cst_38 : f32 to vector<4x256xf32>
      %c0_39 = arith.constant 0 : index
      %c0_40 = arith.constant 0 : index
      %65 = vector.load %arg6[%c0_39, %c0_40] : memref<4x256xf32, #tpu.memory_space<vmem>>, vector<4x256xf32>
      tpu.vector_store %arg6[%c0_39, %c0_40], %64 {strides = array<i32>} : memref<4x256xf32, #tpu.memory_space<vmem>>, vector<4x256xf32>,
      %cst_41 = arith.constant 0.000000e+00 : f32
      %66 = vector.broadcast %cst_41 : f32 to vector<4x256xf32>
      %c0_42 = arith.constant 0 : index
      %c0_43 = arith.constant 0 : index
      %67 = vector.load %arg7[%c0_42, %c0_43] : memref<4x256xf32, #tpu.memory_space<vmem>>, vector<4x256xf32>
      tpu.vector_store %arg7[%c0_42, %c0_43], %66 {strides = array<i32>} : memref<4x256xf32, #tpu.memory_space<vmem>>, vector<4x256xf32>,
      %cst_44 = arith.constant 0.000000e+00 : f32
      %68 = vector.broadcast %cst_44 : f32 to vector<4x256xf32>
      %c0_45 = arith.constant 0 : index
      %c0_46 = arith.constant 0 : index
      %69 = vector.load %arg8[%c0_45, %c0_46] : memref<4x256xf32, #tpu.memory_space<vmem>>, vector<4x256xf32>
      tpu.vector_store %arg8[%c0_45, %c0_46], %68 {strides = array<i32>} : memref<4x256xf32, #tpu.memory_space<vmem>>, vector<4x256xf32>,
      %cst_47 = arith.constant 0.000000e+00 : f32
      %70 = vector.broadcast %cst_47 : f32 to vector<4x256xf32>
      %c0_48 = arith.constant 0 : index
      %c0_49 = arith.constant 0 : index
      %71 = vector.load %arg9[%c0_48, %c0_49] : memref<4x256xf32, #tpu.memory_space<vmem>>, vector<4x256xf32>
      tpu.vector_store %arg9[%c0_48, %c0_49], %70 {strides = array<i32>} : memref<4x256xf32, #tpu.memory_space<vmem>>, vector<4x256xf32>,
    } else {
    }
    %cst = arith.constant 0.000000e+00 : f32
    %3 = vector.broadcast %cst : f32 to vector<4x256xf32>
    %4 = tpu.iota {dimensions = array<i32: 1>} : vector<4x256xi32>
    %c512_i32 = arith.constant 512 : i32
    %5 = arith.muli %arg1, %c512_i32 : i32
    %c0 = arith.constant 0 : index
    %c0_1 = arith.constant 0 : index
    %6 = vector.load %arg2[%c0, %c0_1] : memref<4x512xf32, #tpu.memory_space<vmem>>, vector<4x256xf32>
    %c0_2 = arith.constant 0 : index
    %c0_3 = arith.constant 0 : index
    %7 = vector.load %arg3[%c0_2, %c0_3] : memref<4x512xf32, #tpu.memory_space<vmem>>, vector<4x256xf32>
    %c0_i32_4 = arith.constant 0 : i32
    %8 = arith.addi %5, %c0_i32_4 : i32
    %9 = vector.broadcast %8 : i32 to vector<4x256xi32>
    %10 = arith.addi %9, %4 : vector<4x256xi32>
    %c300_i32 = arith.constant 300 : i32
    %11 = vector.broadcast %c300_i32 : i32 to vector<4x256xi32>
    %12 = arith.cmpi slt, %10, %11 : vector<4x256xi32>
    %cst_5 = arith.constant 0.000000e+00 : f32
    %13 = vector.broadcast %cst_5 : f32 to vector<4x256xf32>
    %14 = arith.select %12, %6, %13 : vector<4x256xi1>, vector<4x256xf32>
    %cst_6 = arith.constant 0.000000e+00 : f32
    %15 = vector.broadcast %cst_6 : f32 to vector<4x256xf32>
    %16 = arith.select %12, %7, %15 : vector<4x256xi1>, vector<4x256xf32>
    %17 = arith.addf %3, %14 : vector<4x256xf32>
    %18 = arith.addf %3, %16 : vector<4x256xf32>
    %19 = arith.mulf %14, %16 : vector<4x256xf32>
    %20 = arith.addf %3, %19 : vector<4x256xf32>
    %21 = arith.mulf %14, %14 : vector<4x256xf32>
    %22 = arith.addf %3, %21 : vector<4x256xf32>
    %23 = arith.mulf %16, %16 : vector<4x256xf32>
    %24 = arith.addf %3, %23 : vector<4x256xf32>
    %c0_7 = arith.constant 0 : index
    %c256 = arith.constant 256 : index
    %25 = vector.load %arg2[%c0_7, %c256] : memref<4x512xf32, #tpu.memory_space<vmem>>, vector<4x256xf32>
    %c0_8 = arith.constant 0 : index
    %c256_9 = arith.constant 256 : index
    %26 = vector.load %arg3[%c0_8, %c256_9] : memref<4x512xf32, #tpu.memory_space<vmem>>, vector<4x256xf32>
    %c256_i32 = arith.constant 256 : i32
    %27 = arith.addi %5, %c256_i32 : i32
    %28 = vector.broadcast %27 : i32 to vector<4x256xi32>
    %29 = arith.addi %28, %4 : vector<4x256xi32>
    %c300_i32_10 = arith.constant 300 : i32
    %30 = vector.broadcast %c300_i32_10 : i32 to vector<4x256xi32>
    %31 = arith.cmpi slt, %29, %30 : vector<4x256xi32>
    %cst_11 = arith.constant 0.000000e+00 : f32
    %32 = vector.broadcast %cst_11 : f32 to vector<4x256xf32>
    %33 = arith.select %31, %25, %32 : vector<4x256xi1>, vector<4x256xf32>
    %cst_12 = arith.constant 0.000000e+00 : f32
    %34 = vector.broadcast %cst_12 : f32 to vector<4x256xf32>
    %35 = arith.select %31, %26, %34 : vector<4x256xi1>, vector<4x256xf32>
    %36 = arith.addf %17, %33 : vector<4x256xf32>
    %37 = arith.addf %18, %35 : vector<4x256xf32>
    %38 = arith.mulf %33, %35 : vector<4x256xf32>
    %39 = arith.addf %20, %38 : vector<4x256xf32>
    %40 = arith.mulf %33, %33 : vector<4x256xf32>
    %41 = arith.addf %22, %40 : vector<4x256xf32>
    %42 = arith.mulf %35, %35 : vector<4x256xf32>
    %43 = arith.addf %24, %42 : vector<4x256xf32>
    %c0_13 = arith.constant 0 : index
    %c0_14 = arith.constant 0 : index
    %44 = vector.load %arg5[%c0_13, %c0_14] : memref<4x256xf32, #tpu.memory_space<vmem>>, vector<4x256xf32>
    %45 = arith.addf %44, %36 : vector<4x256xf32>
    %c0_15 = arith.constant 0 : index
    %c0_16 = arith.constant 0 : index
    %46 = vector.load %arg5[%c0_15, %c0_16] : memref<4x256xf32, #tpu.memory_space<vmem>>, vector<4x256xf32>
    tpu.vector_store %arg5[%c0_15, %c0_16], %45 {strides = array<i32>} : memref<4x256xf32, #tpu.memory_space<vmem>>, vector<4x256xf32>,
    %c0_17 = arith.constant 0 : index
    %c0_18 = arith.constant 0 : index
    %47 = vector.load %arg6[%c0_17, %c0_18] : memref<4x256xf32, #tpu.memory_space<vmem>>, vector<4x256xf32>
    %48 = arith.addf %47, %37 : vector<4x256xf32>
    %c0_19 = arith.constant 0 : index
    %c0_20 = arith.constant 0 : index
    %49 = vector.load %arg6[%c0_19, %c0_20] : memref<4x256xf32, #tpu.memory_space<vmem>>, vector<4x256xf32>
    tpu.vector_store %arg6[%c0_19, %c0_20], %48 {strides = array<i32>} : memref<4x256xf32, #tpu.memory_space<vmem>>, vector<4x256xf32>,
    %c0_21 = arith.constant 0 : index
    %c0_22 = arith.constant 0 : index
    %50 = vector.load %arg7[%c0_21, %c0_22] : memref<4x256xf32, #tpu.memory_space<vmem>>, vector<4x256xf32>
    %51 = arith.addf %50, %39 : vector<4x256xf32>
    %c0_23 = arith.constant 0 : index
    %c0_24 = arith.constant 0 : index
    %52 = vector.load %arg7[%c0_23, %c0_24] : memref<4x256xf32, #tpu.memory_space<vmem>>, vector<4x256xf32>
    tpu.vector_store %arg7[%c0_23, %c0_24], %51 {strides = array<i32>} : memref<4x256xf32, #tpu.memory_space<vmem>>, vector<4x256xf32>,
    %c0_25 = arith.constant 0 : index
    %c0_26 = arith.constant 0 : index
    %53 = vector.load %arg8[%c0_25, %c0_26] : memref<4x256xf32, #tpu.memory_space<vmem>>, vector<4x256xf32>
    %54 = arith.addf %53, %41 : vector<4x256xf32>
    %c0_27 = arith.constant 0 : index
    %c0_28 = arith.constant 0 : index
    %55 = vector.load %arg8[%c0_27, %c0_28] : memref<4x256xf32, #tpu.memory_space<vmem>>, vector<4x256xf32>
    tpu.vector_store %arg8[%c0_27, %c0_28], %54 {strides = array<i32>} : memref<4x256xf32, #tpu.memory_space<vmem>>, vector<4x256xf32>,
    %c0_29 = arith.constant 0 : index
    %c0_30 = arith.constant 0 : index
    %56 = vector.load %arg9[%c0_29, %c0_30] : memref<4x256xf32, #tpu.memory_space<vmem>>, vector<4x256xf32>
    %57 = arith.addf %56, %43 : vector<4x256xf32>
    %c0_31 = arith.constant 0 : index
    %c0_32 = arith.constant 0 : index
    %58 = vector.load %arg9[%c0_31, %c0_32] : memref<4x256xf32, #tpu.memory_space<vmem>>, vector<4x256xf32>
    tpu.vector_store %arg9[%c0_31, %c0_32], %57 {strides = array<i32>} : memref<4x256xf32, #tpu.memory_space<vmem>>, vector<4x256xf32>,
    %c0_i32_33 = arith.constant 0 : i32
    %59 = arith.cmpi eq, %arg1, %c0_i32_33 : i32
    %60 = arith.extui %59 : i1 to i32
    %c0_i32_34 = arith.constant 0 : i32
    %61 = arith.cmpi ne, %60, %c0_i32_34 : i32
    scf.if %61 {
      %c0_35 = arith.constant 0 : index
      %c0_36 = arith.constant 0 : index
      %62 = vector.load %arg5[%c0_35, %c0_36] : memref<4x256xf32, #tpu.memory_space<vmem>>, vector<4x256xf32>
      %cst_37 = arith.constant dense<0.000000e+00> : vector<4xf32>
      %63 = vector.multi_reduction <add>, %62, %cst_37 [1] : vector<4x256xf32> to vector<4xf32>
      %64 = vector.shape_cast %63 : vector<4xf32> to vector<4x1xf32>
      %c0_38 = arith.constant 0 : index
      %c0_39 = arith.constant 0 : index
      %65 = vector.load %arg6[%c0_38, %c0_39] : memref<4x256xf32, #tpu.memory_space<vmem>>, vector<4x256xf32>
      %cst_40 = arith.constant dense<0.000000e+00> : vector<4xf32>
      %66 = vector.multi_reduction <add>, %65, %cst_40 [1] : vector<4x256xf32> to vector<4xf32>
      %67 = vector.shape_cast %66 : vector<4xf32> to vector<4x1xf32>
      %c0_41 = arith.constant 0 : index
      %c0_42 = arith.constant 0 : index
      %68 = vector.load %arg7[%c0_41, %c0_42] : memref<4x256xf32, #tpu.memory_space<vmem>>, vector<4x256xf32>
      %cst_43 = arith.constant dense<0.000000e+00> : vector<4xf32>
      %69 = vector.multi_reduction <add>, %68, %cst_43 [1] : vector<4x256xf32> to vector<4xf32>
      %70 = vector.shape_cast %69 : vector<4xf32> to vector<4x1xf32>
      %c0_44 = arith.constant 0 : index
      %c0_45 = arith.constant 0 : index
      %71 = vector.load %arg8[%c0_44, %c0_45] : memref<4x256xf32, #tpu.memory_space<vmem>>, vector<4x256xf32>
      %cst_46 = arith.constant dense<0.000000e+00> : vector<4xf32>
      %72 = vector.multi_reduction <add>, %71, %cst_46 [1] : vector<4x256xf32> to vector<4xf32>
      %73 = vector.shape_cast %72 : vector<4xf32> to vector<4x1xf32>
      %c0_47 = arith.constant 0 : index
      %c0_48 = arith.constant 0 : index
      %74 = vector.load %arg9[%c0_47, %c0_48] : memref<4x256xf32, #tpu.memory_space<vmem>>, vector<4x256xf32>
      %cst_49 = arith.constant dense<0.000000e+00> : vector<4xf32>
      %75 = vector.multi_reduction <add>, %74, %cst_49 [1] : vector<4x256xf32> to vector<4xf32>
      %76 = vector.shape_cast %75 : vector<4xf32> to vector<4x1xf32>
      %cst_50 = arith.constant 3.000000e+02 : f32
      %77 = vector.broadcast %cst_50 : f32 to vector<4x1xf32>
      %78 = arith.mulf %77, %70 : vector<4x1xf32>
      %79 = arith.mulf %64, %67 : vector<4x1xf32>
      %80 = arith.subf %78, %79 : vector<4x1xf32>
      %cst_51 = arith.constant 3.000000e+02 : f32
      %81 = vector.broadcast %cst_51 : f32 to vector<4x1xf32>
      %82 = arith.mulf %81, %73 : vector<4x1xf32>
      %83 = arith.mulf %64, %64 : vector<4x1xf32>
      %84 = arith.subf %82, %83 : vector<4x1xf32>
      %cst_52 = arith.constant 3.000000e+02 : f32
      %85 = vector.broadcast %cst_52 : f32 to vector<4x1xf32>
      %86 = arith.mulf %85, %76 : vector<4x1xf32>
      %87 = arith.mulf %67, %67 : vector<4x1xf32>
      %88 = arith.subf %86, %87 : vector<4x1xf32>
      %89 = arith.mulf %84, %88 : vector<4x1xf32>
      %90 = math.rsqrt %89 : vector<4x1xf32>
      %91 = arith.mulf %80, %90 : vector<4x1xf32>
      %c0_53 = arith.constant 0 : index
      %c0_54 = arith.constant 0 : index
      %92 = vector.load %arg4[%c0_53, %c0_54] : memref<4x1xf32, #tpu.memory_space<vmem>>, vector<4x1xf32>
      tpu.vector_store %arg4[%c0_53, %c0_54], %91 {strides = array<i32>} : memref<4x1xf32, #tpu.memory_space<vmem>>, vector<4x1xf32>,
    } else {
    }
    return
  }
  func.func @transform_0(%arg0: i32, %arg1: i32) -> (i32, i32) {
    %c0_i32 = arith.constant 0 : i32
    return %arg0, %arg1 : i32, i32
  }
  func.func @transform_1(%arg0: i32, %arg1: i32) -> (i32, i32) {
    %c0_i32 = arith.constant 0 : i32
    return %arg0, %arg1 : i32, i32
  }
  func.func @transform_2(%arg0: i32, %arg1: i32) -> (i32, i32) {
    %c0_i32 = arith.constant 0 : i32
    %c0_i32_0 = arith.constant 0 : i32
    return %arg0, %c0_i32 : i32, i32
  }
}

</mosaic_0001>

<bundles_post_ra>
// kernel: tpu_custom_call.1
= control target key start
LH: loop header
LB: loop body
LE: loop exit
PB: predicated region body
PF: predicated region fallthrough
CT: control target
= control target key end

     0   :  { %7 = vsyncpa [#allocation8], 0  ;;  %s332_s0 = inlined_call_operand.hbm [shape: f32[4,300], index: 0, kind: input, shape index: {}]   ;;  %s333_s1 = inlined_call_operand.hbm [shape: f32[4,300], index: 1, kind: input, shape index: {}]   ;;  %s334_s2 = inlined_call_operand.vmem [shape: f32[4,1], index: 2, kind: output, shape index: {}]  }
   0x1   :  { %8 = vsyncpa [#allocation10], 0 }
   0x2   :  { %13 = vsyncadd [#allocation8], 64  ;;  %s278_s9 = smov [#allocation7]   ;;  %s230_s13 = scalar_lea.hbm %s332_s0, 192 }
   0x3   :  { %s15_s10 = sshll.u32 %s278_s9, 4  ;;  %p231_p0 = scmp.ne.s32.totalorder %s332_s0, %s230_s13  ;;  %s16_s10 = int_to_ptr.vmem [resolvable:$true] %s15_s10 }
   0x4   :  { %p234_p1 = scmp.lt.u32.totalorder %s230_s13, %s332_s0 }
   0x6   :  { %p236_p2 = pnand %p234_p1, %p231_p0 }
   0x8   :  { %239 = shalt.err (!%p236_p2)
}
   0x9   :  { %s240_s18 = scalar_lea.vmem %s16_s10, 192  ;;  %s244_s19 = scalar_lea.vmem %s16_s10, 256 }
   0xa   :  { %p241_p3 = scmp.ne.s32.totalorder %s16_s10, %s240_s18  ;;  %p245_p4 = scmp.lt.s32.totalorder %s16_s10, %s16_s10 }
   0xb   :  { %p246_p5 = scmp.lt.s32.totalorder %s244_s19, %s240_s18 }
   0xd   :  { %p247_p6 = por %p246_p5, %p245_p4 }
   0xf   :  { %p248_p7 = pnand %p247_p6, %p241_p3 }
  0x11   :  { %251 = shalt.err (!%p248_p7)
}
  0x12   :  { %18 = dma.hbm_to_vmem [thread:$0]  %s332_s0, 192, %s16_s10, [#allocation8]  }
  0x13   :  { %23 = vsyncadd [#allocation10], 64  ;;  %s279_s22 = smov [#allocation9]   ;;  %s252_s26 = scalar_lea.hbm %s333_s1, 192 }
  0x14   :  { %s25_s23 = sshll.u32 %s279_s22, 4  ;;  %p253_p8 = scmp.ne.s32.totalorder %s333_s1, %s252_s26  ;;  %s26_s23 = int_to_ptr.vmem [resolvable:$true] %s25_s23 }
  0x15   :  { %p256_p9 = scmp.lt.u32.totalorder %s252_s26, %s333_s1 }
  0x17   :  { %p258_p10 = pnand %p256_p9, %p253_p8 }
  0x19   :  { %261 = shalt.err (!%p258_p10)
}
  0x1a   :  { %s262_s3 = scalar_lea.vmem %s26_s23, 192  ;;  %s266_s0 = scalar_lea.vmem %s26_s23, 256 }
  0x1b   :  { %p263_p11 = scmp.ne.s32.totalorder %s26_s23, %s262_s3  ;;  %p267_p12 = scmp.lt.s32.totalorder %s26_s23, %s26_s23 }
  0x1c   :  { %p268_p13 = scmp.lt.s32.totalorder %s266_s0, %s262_s3 }
  0x1e   :  { %p269_p0 = por %p268_p13, %p267_p12 }
  0x20   :  { %p270_p1 = pnand %p269_p0, %p263_p11 }
  0x22   :  { %273 = shalt.err (!%p270_p1)
}
  0x23   :  { %28 = dma.hbm_to_vmem [thread:$0]  %s333_s1, 192, %s26_s23, [#allocation10]  }
  0x24   :  { %274 = dma.done.wait [#allocation8], 256  }
  0x25   :  { %275 = vsyncadd [#allocation8], 4294967040 }
  0x26   :  { %276 = dma.done.wait [#allocation10], 256  }
  0x27   :  { %277 = vsyncadd [#allocation10], 4294967040  ;;  %v44_v0 = vlaneseq  ;;  %v48_v3 = vld [vmem:[#allocation7] sm:$0xff]  ;;  %v81_v4 = vld [vmem:[#allocation7 + $0x8] sm:$0xff]  ;;  %vm157_vm1 = vcmask 1043456   ;;  %vm211_vm2 = vcmask 3072  }
  0x28   :  { %v49_v5 = vld [vmem:[#allocation9] sm:$0xff]  ;;  %v56_v6 = vcombine.high %v48_v3, %v48_v3  ;;  %v73_v8 = vmul.f32 %v48_v3, %v48_v3  ;;  %v82_v10 = vld [vmem:[#allocation9 + $0x8] sm:$0xff] }
  0x29   :  { %v45_v1 = vand.u32 127, %v44_v0  ;;  %v61_v9 = vcombine.high %v49_v5, %v49_v5  ;;  %v77_v14 = vmul.f32 %v49_v5, %v49_v5  ;;  %v69_v25 = vmul.f32 %v49_v5, %v48_v3 }
  0x2a   :  { %v159_v15 = vsel %vm157_vm1, %v56_v6, 0.0  ;;  %v74_v16 = vmul.f32 %v56_v6, %v56_v6 }
  0x2b   :  { %v85_v2 = vadd.s32 256, %v45_v1  ;;  %v168_v18 = vsel %vm157_vm1, %v61_v9, 0.0  ;;  %v78_v21 = vmul.f32 %v61_v9, %v61_v9  ;;  %v70_v26 = vmul.f32 %v61_v9, %v56_v6 }
  0x2c   :  { %v222_v23 = vcombine.low %v74_v16, %v74_v16 }
  0x2d   :  { %vm87_vm0 = vcmp.lt.s32.totalorder %v85_v2, 300  ;;  %v223_v30 = vcombine.low %v78_v21, %v78_v21  ;;  %v221_v41 = vcombine.low %v70_v26, %v70_v26 }
  0x2e   :  { %v92_v7 = vsel %vm87_vm0, %v81_v4, 0.0  ;;  %v97_v13 = vsel %vm87_vm0, %v82_v10, 0.0  ;;  %v186_v32 = vsel %vm157_vm1, %v222_v23, 0.0 }
  0x2f   :  { %v99_v11 = vadd.f32 %v92_v7, %v48_v3  ;;  %v107_v12 = vmul.f32 %v92_v7, %v92_v7  ;;  %v101_v17 = vadd.f32 %v97_v13, %v49_v5  ;;  %v111_v22 = vmul.f32 %v97_v13, %v97_v13 }
  0x30   :  { %v103_v34 = vmul.f32 %v97_v13, %v92_v7  ;;  %v195_v37 = vsel %vm157_vm1, %v223_v30, 0.0  ;;  %v177_v45 = vsel %vm157_vm1, %v221_v41, 0.0 }
  0x31   :  { %v118_v19 = vcombine.low %v99_v11, %v56_v6  ;;  %v109_v20 = vadd.f32 %v107_v12, %v73_v8  ;;  %v125_v24 = vcombine.low %v101_v17, %v61_v9  ;;  %v113_v29 = vadd.f32 %v111_v22, %v77_v14 }
  0x32   :  { %v105_v40 = vadd.f32 %v103_v34, %v69_v25 }
  0x33   :  { %v158_v27 = vsel %vm157_vm1, %v118_v19, 0.0  ;;  %v139_v28 = vcombine.low %v109_v20, %v74_v16  ;;  %v167_v33 = vsel %vm157_vm1, %v125_v24, 0.0  ;;  %v146_v36 = vcombine.low %v113_v29, %v78_v21 }
  0x34   :  { %v160_v31 = vadd.f32 %v159_v15, %v158_v27  ;;  %v169_v39 = vadd.f32 %v168_v18, %v167_v33  ;;  %v132_v44 = vcombine.low %v105_v40, %v70_v26 }
  0x35   :  { %v185_v35 = vsel %vm157_vm1, %v139_v28, 0.0  ;;  %v194_v42 = vsel %vm157_vm1, %v146_v36, 0.0 }
  0x36   :  { %161 = vadd.xlane.f32.xlu0 %v160_v31  ;;  %v187_v38 = vadd.f32 %v186_v32, %v185_v35  ;;  %v196_v43 = vadd.f32 %v195_v37, %v194_v42  ;;  %v176_v46 = vsel %vm157_vm1, %v132_v44, 0.0 }
  0x37   :  { %v178_v47 = vadd.f32 %v177_v45, %v176_v46 }
  0x38   :  { %188 = vadd.xlane.f32.xlu1 %v187_v38 }
  0x3a   :  { %170 = vadd.xlane.f32.xlu0 %v169_v39 }
  0x3c   :  { %197 = vadd.xlane.f32.xlu1 %v196_v43 }
  0x3e   :  { %179 = vadd.xlane.f32.xlu0 %v178_v47 }
  0xc3   :  { %v162_v48 = vpop.xlane.xlu0 %161 }
  0xc4   :  { %v203_v51 = vmul.f32 %v162_v48, %v162_v48 }
  0xc5   :  { %v189_v49 = vpop.xlane.xlu1 %188 }
  0xc6   :  { %v202_v52 = vmul.f32 300.0, %v189_v49 }
  0xc7   :  { %v171_v50 = vpop.xlane.xlu0 %170 }
  0xc8   :  { %v206_v53 = vmul.f32 %v171_v50, %v171_v50  ;;  %v204_v56 = vsub.f32 %v202_v52, %v203_v51  ;;  %v200_v61 = vmul.f32 %v171_v50, %v162_v48 }
  0xc9   :  { %v198_v54 = vpop.xlane.xlu1 %197 }
  0xca   :  { %v205_v55 = vmul.f32 300.0, %v198_v54 }
  0xcb   :  { %v180_v59 = vpop.xlane.xlu0 %179 }
  0xcc   :  { %v207_v57 = vsub.f32 %v205_v55, %v206_v53  ;;  %v199_v60 = vmul.f32 300.0, %v180_v59 }
  0xce   :  { %v208_v58 = vmul.f32 %v207_v57, %v204_v56  ;;  %v201_v62 = vsub.f32 %v199_v60, %v200_v61 }
  0xd0   :  { %228 = vrsqrt.f32 %v208_v58 }
  0xda   :  { %v229_v63 = vpop.eup %228 }
  0xdb   :  { %v210_v0 = vmul.f32 %v229_v63, %v201_v62 }
  0xdd   :  { %212 = vst.msk [vmem:[%s334_s2] sm:$0xf] %vm211_vm2, %v210_v0 }
  0xde   :  { %217 = vsyncpa [#allocation8], 1 }
  0xdf   :  { %218 = vsyncpa [#allocation10], 1 }

</bundles_post_ra>
